<compile_context>
chip_gen: v5e
topology: v5e:2x2
jax: 0.10.0
libtpu: 0.0.40
codegen_flags: <defaults>
</compile_context>

<pallas_src>
import jax
import jax.numpy as jnp
from jax.experimental import pallas as pl
from jax.experimental.pallas import tpu as pltpu


def _round_up(x, m):
    return ((x + m - 1) // m) * m


def _actor_kernel(ma_ref, x_ref, w1_ref, b1_ref, w2_ref, b2_ref,
                  w3_ref, b3_ref, o_ref):
    """One batch tile of the 3-layer MLP. Weights are bf16 (MXU operands);
    accumulation and elementwise work are f32; tanh stays on the EUP."""
    max_action = ma_ref[0]                                  # SMEM scalar (f32)
    x = x_ref[...]                                          # (TB, S) f32

    # Layer 1: Linear(state_dim -> hidden_pad) + ReLU
    h = jnp.dot(x.astype(jnp.bfloat16), w1_ref[...],
                preferred_element_type=jnp.float32)
    h = jnp.maximum(h + b1_ref[...], 0.0)

    # Layer 2: Linear(hidden_pad -> hidden_pad) + ReLU
    h = jnp.dot(h.astype(jnp.bfloat16), w2_ref[...],
                preferred_element_type=jnp.float32)
    h = jnp.maximum(h + b2_ref[...], 0.0)

    # Layer 3: Linear(hidden_pad -> action_pad), tanh, scale by max_action
    h = jnp.dot(h.astype(jnp.bfloat16), w3_ref[...],
                preferred_element_type=jnp.float32)
    h = h + b3_ref[...]
    o_ref[...] = (max_action * jnp.tanh(h)).astype(o_ref.dtype)


def _prepare_params(params):
    """Zero-pad hidden/action dims to multiples of 128 (lane-dense) and cast
    the MXU operands (weights) to bf16. Zero padding leaves the math
    unchanged: padded hidden units are relu(0) = 0 and contribute nothing."""
    w1, b1, w2, b2, w3, b3 = params
    S, H = w1.shape
    A = w3.shape[1]
    Hp = _round_up(H, 128)
    Ap = _round_up(A, 128)
    f32 = jnp.float32

    w1p = jnp.zeros((S, Hp), f32).at[:, :H].set(w1).astype(jnp.bfloat16)
    b1p = jnp.zeros((1, Hp), f32).at[:, :H].set(b1)
    w2p = jnp.zeros((Hp, Hp), f32).at[:H, :H].set(w2).astype(jnp.bfloat16)
    b2p = jnp.zeros((1, Hp), f32).at[:, :H].set(b2)
    w3p = jnp.zeros((Hp, Ap), f32).at[:H, :A].set(w3).astype(jnp.bfloat16)
    b3p = jnp.zeros((1, Ap), f32).at[:, :A].set(b3)
    return (w1p, b1p, w2p, b2p, w3p, b3p), A, Ap


def _choose_batch_tile(B):
    # Large enough to amortize the ~0.35 us per-step overhead, multiple of 8
    # (f32 sublane). 512 keeps per-step VMEM tiny even for bigger hidden dims
    # (budget against v7x's 64 MiB physical / 32 MiB default scoped VMEM).
    if B >= 512:
        return 512
    return max(8, _round_up(B, 8))


def actor_forward(state, params, max_action):
    """state: (B, state_dim) float32. Returns (B, action_dim) float32."""
    (w1, b1, w2, b2, w3, b3), A, Ap = _prepare_params(params)
    B, S = state.shape
    TB = _choose_batch_tile(B)
    Bp = _round_up(B, TB)
    nb = Bp // TB

    if Bp != B:
        state = jnp.pad(state, ((0, Bp - B), (0, 0)))

    ma = jnp.full((1,), max_action, jnp.float32)            # runtime scalar

    # Weights/biases: whole array per step, index_map constant -> VMEM-resident.
    resident = lambda a: pl.BlockSpec(a.shape, lambda i: (0,) * a.ndim)

    out = pl.pallas_call(
        _actor_kernel,
        out_shape=jax.ShapeDtypeStruct((Bp, Ap), jnp.float32),
        grid=(nb,),
        in_specs=[
            pl.BlockSpec(memory_space=pltpu.MemorySpace.SMEM),   # max_action
            pl.BlockSpec((TB, S), lambda i: (i, 0)),             # state tiles
            resident(w1), resident(b1),
            resident(w2), resident(b2),
            resident(w3), resident(b3),
        ],
        out_specs=pl.BlockSpec((TB, Ap), lambda i: (i, 0)),
        compiler_params=pltpu.CompilerParams(
            dimension_semantics=("parallel",),   # shard batch tiles on v7x's 2 TCs
        ),
    )(ma, state, w1, b1, w2, b2, w3, b3)

    return out[:B, :A]


def init_actor_params(key, state_dim, action_dim, hidden_dim):
    """Deterministic init; weights stored as (in, out) i.e. W^T vs PyTorch."""
    ks = jax.random.split(key, 6)

    def linear(kw, kb, fan_in, fan_out):
        # Match PyTorch's default uniform(-1/sqrt(fan_in), 1/sqrt(fan_in)).
        bound = 1.0 / jnp.sqrt(jnp.float32(fan_in))
        w = jax.random.uniform(kw, (fan_in, fan_out), jnp.float32,
                               minval=-bound, maxval=bound)
        b = jax.random.uniform(kb, (1, fan_out), jnp.float32,
                               minval=-bound, maxval=bound)
        return w, b

    w1, b1 = linear(ks[0], ks[1], state_dim, hidden_dim)
    w2, b2 = linear(ks[2], ks[3], hidden_dim, hidden_dim)
    w3, b3 = linear(ks[4], ks[5], hidden_dim, action_dim)
    return (w1, b1, w2, b2, w3, b3)


def actor_ref(state, params, max_action):
    """Pure-JAX f32 reference (matches the PyTorch module semantics)."""
    w1, b1, w2, b2, w3, b3 = params
    a = jnp.maximum(state @ w1 + b1, 0.0)
    a = jnp.maximum(a @ w2 + b2, 0.0)
    return max_action * jnp.tanh(a @ w3 + b3)


if __name__ == "__main__":
    state_dim, action_dim, hidden_dim = 16, 4, 32
    max_action = 2.0

    key = jax.random.PRNGKey(0)
    k_params, k_small, k_large = jax.random.split(key, 3)
    params = init_actor_params(k_params, state_dim, action_dim, hidden_dim)

    # Small-shape check (matches the module spec: batch=2).
    state = jax.random.normal(k_small, (2, state_dim), jnp.float32)
    out = jax.block_until_ready(actor_forward(state, params, max_action))
    ref = actor_ref(state, params, max_action)
    assert out.shape == (2, action_dim)
    # bf16 MXU operands vs f32 reference -> loose tolerance.
    assert jnp.allclose(out, ref, atol=5e-2, rtol=5e-2), "small-batch mismatch"

    # Larger batch exercises the pipelined batch grid (nb > 1, parallel axis).
    state_l = jax.random.normal(k_large, (1024, state_dim), jnp.float32)
    out_l = jax.block_until_ready(actor_forward(state_l, params, max_action))
    ref_l = actor_ref(state_l, params, max_action)
    assert out_l.shape == (1024, action_dim)
    assert jnp.allclose(out_l, ref_l, atol=5e-2, rtol=5e-2), "large-batch mismatch"

    print("KERNEL_OK")
</pallas_src>

<mosaic_0001>
module attributes {stable_mosaic.version = 11 : i64} {
  func.func @_actor_kernel(%arg0: i32, %arg1: memref<1xf32, #tpu.memory_space<smem>>, %arg2: memref<8x16xf32, #tpu.memory_space<vmem>>, %arg3: memref<16x128xbf16, #tpu.memory_space<vmem>>, %arg4: memref<1x128xf32, #tpu.memory_space<vmem>>, %arg5: memref<128x128xbf16, #tpu.memory_space<vmem>>, %arg6: memref<1x128xf32, #tpu.memory_space<vmem>>, %arg7: memref<128x128xbf16, #tpu.memory_space<vmem>>, %arg8: memref<1x128xf32, #tpu.memory_space<vmem>>, %arg9: memref<8x128xf32, #tpu.memory_space<vmem>>) attributes {dimension_semantics = [#tpu.dimension_semantics<parallel>], iteration_bounds = array<i64: 1>, scalar_prefetch = 0 : i64, scratch_operands = 0 : i64, tpu.core_type = #tpu.core_type<tc>, window_params = [{transform_indices = @transform_0, window_bounds = array<i64: 1>}, {transform_indices = @transform_1, window_bounds = array<i64: 8, 16>}, {pipeline_mode = #tpu.pipeline_mode<synchronous>, transform_indices = @transform_2, window_bounds = array<i64: 16, 128>}, {pipeline_mode = #tpu.pipeline_mode<synchronous>, transform_indices = @transform_3, window_bounds = array<i64: 1, 128>}, {pipeline_mode = #tpu.pipeline_mode<synchronous>, transform_indices = @transform_4, window_bounds = array<i64: 128, 128>}, {pipeline_mode = #tpu.pipeline_mode<synchronous>, transform_indices = @transform_5, window_bounds = array<i64: 1, 128>}, {pipeline_mode = #tpu.pipeline_mode<synchronous>, transform_indices = @transform_6, window_bounds = array<i64: 128, 128>}, {pipeline_mode = #tpu.pipeline_mode<synchronous>, transform_indices = @transform_7, window_bounds = array<i64: 1, 128>}, {transform_indices = @transform_8, window_bounds = array<i64: 8, 128>}]} {
    %c0 = arith.constant 0 : index
    %0 = memref.load %arg1[%c0] : memref<1xf32, #tpu.memory_space<smem>>
    %c0_0 = arith.constant 0 : index
    %c0_1 = arith.constant 0 : index
    %1 = vector.load %arg2[%c0_0, %c0_1] : memref<8x16xf32, #tpu.memory_space<vmem>>, vector<8x16xf32>
    %2 = arith.truncf %1 : vector<8x16xf32> to vector<8x16xbf16>
    %c0_2 = arith.constant 0 : index
    %c0_3 = arith.constant 0 : index
    %3 = vector.load %arg3[%c0_2, %c0_3] : memref<16x128xbf16, #tpu.memory_space<vmem>>, vector<16x128xbf16>
    %cst = arith.constant dense<0.000000e+00> : vector<8x128xf32>
    %4 = tpu.matmul %2, %3, %cst {dimension_numbers = #tpu.dot_dimension_numbers<[1], [0], [0], [1], [0, 0, 1, 1], [], []>} : vector<8x16xbf16>, vector<16x128xbf16>, vector<8x128xf32> -> vector<8x128xf32>
    %c0_4 = arith.constant 0 : index
    %c0_5 = arith.constant 0 : index
    %5 = vector.load %arg4[%c0_4, %c0_5] : memref<1x128xf32, #tpu.memory_space<vmem>>, vector<1x128xf32>
    %6 = vector.broadcast %5 : vector<1x128xf32> to vector<8x128xf32>
    %7 = arith.addf %4, %6 : vector<8x128xf32>
    %cst_6 = arith.constant 0.000000e+00 : f32
    %8 = vector.broadcast %cst_6 : f32 to vector<8x128xf32>
    %9 = arith.maximumf %7, %8 : vector<8x128xf32>
    %10 = arith.truncf %9 : vector<8x128xf32> to vector<8x128xbf16>
    %c0_7 = arith.constant 0 : index
    %c0_8 = arith.constant 0 : index
    %11 = vector.load %arg5[%c0_7, %c0_8] : memref<128x128xbf16, #tpu.memory_space<vmem>>, vector<128x128xbf16>
    %cst_9 = arith.constant dense<0.000000e+00> : vector<8x128xf32>
    %12 = tpu.matmul %10, %11, %cst_9 {dimension_numbers = #tpu.dot_dimension_numbers<[1], [0], [0], [1], [0, 0, 1, 1], [], []>} : vector<8x128xbf16>, vector<128x128xbf16>, vector<8x128xf32> -> vector<8x128xf32>
    %c0_10 = arith.constant 0 : index
    %c0_11 = arith.constant 0 : index
    %13 = vector.load %arg6[%c0_10, %c0_11] : memref<1x128xf32, #tpu.memory_space<vmem>>, vector<1x128xf32>
    %14 = vector.broadcast %13 : vector<1x128xf32> to vector<8x128xf32>
    %15 = arith.addf %12, %14 : vector<8x128xf32>
    %cst_12 = arith.constant 0.000000e+00 : f32
    %16 = vector.broadcast %cst_12 : f32 to vector<8x128xf32>
    %17 = arith.maximumf %15, %16 : vector<8x128xf32>
    %18 = arith.truncf %17 : vector<8x128xf32> to vector<8x128xbf16>
    %c0_13 = arith.constant 0 : index
    %c0_14 = arith.constant 0 : index
    %19 = vector.load %arg7[%c0_13, %c0_14] : memref<128x128xbf16, #tpu.memory_space<vmem>>, vector<128x128xbf16>
    %cst_15 = arith.constant dense<0.000000e+00> : vector<8x128xf32>
    %20 = tpu.matmul %18, %19, %cst_15 {dimension_numbers = #tpu.dot_dimension_numbers<[1], [0], [0], [1], [0, 0, 1, 1], [], []>} : vector<8x128xbf16>, vector<128x128xbf16>, vector<8x128xf32> -> vector<8x128xf32>
    %c0_16 = arith.constant 0 : index
    %c0_17 = arith.constant 0 : index
    %21 = vector.load %arg8[%c0_16, %c0_17] : memref<1x128xf32, #tpu.memory_space<vmem>>, vector<1x128xf32>
    %22 = vector.broadcast %21 : vector<1x128xf32> to vector<8x128xf32>
    %23 = arith.addf %20, %22 : vector<8x128xf32>
    %24 = math.tanh %23 : vector<8x128xf32>
    %25 = vector.broadcast %0 : f32 to vector<8x128xf32>
    %26 = arith.mulf %25, %24 : vector<8x128xf32>
    %c0_18 = arith.constant 0 : index
    %c0_19 = arith.constant 0 : index
    %27 = vector.load %arg9[%c0_18, %c0_19] : memref<8x128xf32, #tpu.memory_space<vmem>>, vector<8x128xf32>
    tpu.vector_store %arg9[%c0_18, %c0_19], %26 {strides = array<i32>} : memref<8x128xf32, #tpu.memory_space<vmem>>, vector<8x128xf32>,
    return
  }
  func.func @transform_0(%arg0: i32) -> i32 {
    %c0_i32 = arith.constant 0 : i32
    %c0_i32_0 = arith.constant 0 : i32
    return %c0_i32 : i32
  }
  func.func @transform_1(%arg0: i32) -> (i32, i32) {
    %c0_i32 = arith.constant 0 : i32
    %c0_i32_0 = arith.constant 0 : i32
    return %arg0, %c0_i32 : i32, i32
  }
  func.func @transform_2(%arg0: i32) -> (i32, i32) {
    %c0_i32 = arith.constant 0 : i32
    %c0_i32_0 = arith.constant 0 : i32
    %c0_i32_1 = arith.constant 0 : i32
    return %c0_i32, %c0_i32_0 : i32, i32
  }
  func.func @transform_3(%arg0: i32) -> (i32, i32) {
    %c0_i32 = arith.constant 0 : i32
    %c0_i32_0 = arith.constant 0 : i32
    %c0_i32_1 = arith.constant 0 : i32
    return %c0_i32, %c0_i32_0 : i32, i32
  }
  func.func @transform_4(%arg0: i32) -> (i32, i32) {
    %c0_i32 = arith.constant 0 : i32
    %c0_i32_0 = arith.constant 0 : i32
    %c0_i32_1 = arith.constant 0 : i32
    return %c0_i32, %c0_i32_0 : i32, i32
  }
  func.func @transform_5(%arg0: i32) -> (i32, i32) {
    %c0_i32 = arith.constant 0 : i32
    %c0_i32_0 = arith.constant 0 : i32
    %c0_i32_1 = arith.constant 0 : i32
    return %c0_i32, %c0_i32_0 : i32, i32
  }
  func.func @transform_6(%arg0: i32) -> (i32, i32) {
    %c0_i32 = arith.constant 0 : i32
    %c0_i32_0 = arith.constant 0 : i32
    %c0_i32_1 = arith.constant 0 : i32
    return %c0_i32, %c0_i32_0 : i32, i32
  }
  func.func @transform_7(%arg0: i32) -> (i32, i32) {
    %c0_i32 = arith.constant 0 : i32
    %c0_i32_0 = arith.constant 0 : i32
    %c0_i32_1 = arith.constant 0 : i32
    return %c0_i32, %c0_i32_0 : i32, i32
  }
  func.func @transform_8(%arg0: i32) -> (i32, i32) {
    %c0_i32 = arith.constant 0 : i32
    %c0_i32_0 = arith.constant 0 : i32
    return %arg0, %c0_i32 : i32, i32
  }
}

</mosaic_0001>

<bundles_post_ra>
// kernel: tpu_custom_call.1
= control target key start
LH: loop header
LB: loop body
LE: loop exit
PB: predicated region body
PF: predicated region fallthrough
CT: control target
= control target key end

     0   :  { %14 = vsyncpa [#allocation4], 0  ;;  %s619_s0 = inlined_call_operand.<no memory space> [shape: f32[1], index: 0, kind: input, shape index: {}]   ;;  %s620_s1 = inlined_call_operand.hbm [shape: f32[8,16], index: 1, kind: input, shape index: {}]   ;;  %s621_s2 = inlined_call_operand.hbm [shape: bf16[16,128], index: 2, kind: input, shape index: {}]   ;;  %s622_s3 = inlined_call_operand.vmem [shape: f32[1,128], index: 3, kind: input, shape index: {}]   ;;  %s623_s4 = inlined_call_operand.hbm [shape: bf16[128,128], index: 4, kind: input, shape index: {}]   ;;  %s624_s5 = inlined_call_operand.vmem [shape: f32[1,128], index: 5, kind: input, shape index: {}]   ;;  %s625_s6 = inlined_call_operand.hbm [shape: bf16[128,128], index: 6, kind: input, shape index: {}]   ;;  %s626_s7 = inlined_call_operand.vmem [shape: f32[1,128], index: 7, kind: input, shape index: {}]   ;;  %s627_s8 = inlined_call_operand.hbm [shape: f32[8,128], index: 8, kind: output, shape index: {}]  }
   0x1   :  { %15 = vsyncpa [#allocation7], 0 }
   0x2   :  { %16 = vsyncpa [#allocation10], 0  ;;  %s35_s29 = sshll.u32 %s621_s2, 4  ;;  %s36_s29 = int_to_ptr.hbm [resolvable:$true] %s35_s29 }
   0x3   :  { %17 = vsyncpa [#allocation5], 0  ;;  %s540_s30 = smov [#allocation6]   ;;  %s25_s12 = sshll.u32 %s620_s1, 4  ;;  %s26_s12 = int_to_ptr.hbm [resolvable:$true] %s25_s12 }
   0x4   :  { %s37_s9 = sshll.u32 %s540_s30, 4  ;;  %s541_s13 = smov 64   ;;  %s38_s9 = int_to_ptr.vmem [resolvable:$true] %s37_s9 }
   0x5   :  { %s542_s14 = smov 4   ;;  %s543_s15 = smov [#allocation3]  }
   0x6   :  { %43 = dma.hbm_to_vmem [thread:$0]  %s36_s29, 128, %s38_s9, [#allocation7], %s541_s13, %s541_s13, %s542_s14  }
   0x7   :  { %s27_s16 = sshll.u32 %s543_s15, 4  ;;  %s50_s19 = sshll.u32 %s623_s4, 4  ;;  %s28_s16 = int_to_ptr.vmem [resolvable:$true] %s27_s16  ;;  %s51_s19 = int_to_ptr.hbm [resolvable:$true] %s50_s19 }
   0x8   :  { %30 = dma.hbm_to_vmem [thread:$0]  %s26_s12, 128, %s28_s16, [#allocation4]  }
   0x9   :  { %s65_s21 = sshll.u32 %s625_s6, 4  ;;  %s544_s22 = smov [#allocation8]   ;;  %s66_s21 = int_to_ptr.hbm [resolvable:$true] %s65_s21 }
   0xa   :  { %s52_s23 = sshll.u32 %s544_s22, 4  ;;  %s545_s1 = smov [#allocation9]   ;;  %s53_s23 = int_to_ptr.vmem [resolvable:$true] %s52_s23 }
   0xb   :  { %58 = dma.hbm_to_vmem [thread:$0]  %s51_s19, 1024, %s53_s23, [#allocation7], %s541_s13, %s541_s13, %s542_s14  }
   0xc   :  { %s67_s24 = sshll.u32 %s545_s1, 4  ;;  %s68_s24 = int_to_ptr.vmem [resolvable:$true] %s67_s24 }
   0xd   :  { %73 = dma.hbm_to_vmem [thread:$0]  %s66_s21, 1024, %s68_s24, [#allocation10], %s541_s13, %s541_s13, %s542_s14  }
   0xe   :  { %532 = dma.done.wait [#allocation4], 128  }
   0xf   :  { %533 = vsyncadd [#allocation4], 4294967168 }
  0x10   :  { %534 = dma.done.wait [#allocation7], 1152  }
  0x11   :  { %535 = vsyncadd [#allocation7], 4294966144 }
  0x12   :  { %536 = dma.done.wait [#allocation10], 1024  }
  0x13   :  { %537 = vsyncadd [#allocation10], 4294966272  ;;  %v383_v0 = vld [vmem:[#allocation6] sm:$0xff]  ;;  %v94_v1 = vld [vmem:[#allocation3] sm:$0xff]  ;;  %vm108_vm0 = vcmask 130048   ;;  %v292_v34 = vstv %s619_s0  ;;  %s546_s30 = smov [#allocation11]  }
  0x14   :  { %v391_v2 = vld [vmem:[#allocation8 + $0x38] sm:$0xff]  ;;  %v95_v3 = vpack.c.bf16 %v94_v1, %v94_v1  ;;  %119 = vmatpush.bf16.msra.mxu0 %v383_v0  ;;  %v390_v4 = vld [vmem:[#allocation8 + $0x30] sm:$0xff]  ;;  %v389_v5 = vld [vmem:[#allocation8 + $0x28] sm:$0xff]  ;;  %s300_s9 = sshll.u32 %s546_s30, 4  ;;  %s302_s11 = sshll.u32 %s627_s8, 4  ;;  %s301_s9 = int_to_ptr.vmem [resolvable:$true] %s300_s9  ;;  %s303_s11 = int_to_ptr.hbm [resolvable:$true] %s302_s11 }
  0x15   :  { %195 = vmatpush.bf16.msra.mxu1 %v391_v2  ;;  %v388_v6 = vld [vmem:[#allocation8 + $0x20] sm:$0xff]  ;;  %v387_v7 = vld [vmem:[#allocation8 + $0x18] sm:$0xff]  ;;  %v386_v8 = vld [vmem:[#allocation8 + $0x10] sm:$0xff] }
  0x16   :  { %v385_v9 = vld [vmem:[#allocation8 + $0x8] sm:$0xff]  ;;  %v384_v10 = vld [vmem:[#allocation8] sm:$0xff]  ;;  %v399_v11 = vld [vmem:[#allocation9 + $0x38] sm:$0xff] }
  0x17   :  { %318 = vmatmul.msk.bf16.vlgmr.msra.gmra.mxu0 %vm108_vm0, %v95_v3  ;;  %278 = vmatpush.bf16.msra.mxu2 %v399_v11  ;;  %v398_v12 = vld [vmem:[#allocation9 + $0x30] sm:$0xff]  ;;  %v397_v13 = vld [vmem:[#allocation9 + $0x28] sm:$0xff]  ;;  %v396_v14 = vld [vmem:[#allocation9 + $0x20] sm:$0xff] }
  0x18   :  { %v395_v15 = vld [vmem:[#allocation9 + $0x18] sm:$0xff]  ;;  %v394_v16 = vld [vmem:[#allocation9 + $0x10] sm:$0xff]  ;;  %v393_v23 = vld [vmem:[#allocation9 + $0x8] sm:$0xff] }
  0x19   :  { %196 = vmatpush.bf16.msra.mxu1 %v390_v4  ;;  %v407_v17 = vld [vmem:[%s622_s3] ss:$0 sm:$0xff]  ;;  %v392_v24 = vld [vmem:[#allocation9] sm:$0xff] }
  0x1a   :  { %v408_v25 = vld [vmem:[%s624_s5] ss:$0 sm:$0xff] }
  0x1b   :  { %279 = vmatpush.bf16.msra.mxu2 %v398_v12  ;;  %v409_v31 = vld [vmem:[%s626_s7] ss:$0 sm:$0xff] }
  0x1d   :  { %197 = vmatpush.bf16.msra.mxu1 %v389_v5 }
  0x1f   :  { %280 = vmatpush.bf16.msra.mxu2 %v397_v13 }
  0x21   :  { %198 = vmatpush.bf16.msra.mxu1 %v388_v6 }
  0x23   :  { %281 = vmatpush.bf16.msra.mxu2 %v396_v14 }
  0x25   :  { %199 = vmatpush.bf16.msra.mxu1 %v387_v7 }
  0x27   :  { %282 = vmatpush.bf16.msra.mxu2 %v395_v15 }
  0x29   :  { %200 = vmatpush.bf16.msra.mxu1 %v386_v8 }
  0x2b   :  { %283 = vmatpush.bf16.msra.mxu2 %v394_v16 }
  0x2d   :  { %201 = vmatpush.bf16.msra.mxu1 %v385_v9 }
  0x2f   :  { %284 = vmatpush.bf16.msra.mxu2 %v393_v23 }
  0x31   :  { %202 = vmatpush.bf16.msra.mxu1 %v384_v10 }
  0x33   :  { %285 = vmatpush.bf16.msra.mxu2 %v392_v24 }
  0x94   :  { %v121_v18 = vpop.f32.mrf.mxu0 }
  0x95   :  { %v122_v19 = vadd.f32 %v407_v17, %v121_v18 }
  0x97   :  { %v125_v20 = vmax.f32 %v122_v19, 0.0 }
  0x99   :  { %v126_v21 = vpack.c.bf16 %v125_v20, %v125_v20 }
  0x9b   :  { %203 = vmatmul.bf16.vlgmr.msra.gmra.mxu1 %v126_v21 }
  0x9c   :  { %v123_v22 = vpop.f32.mrf.mxu0 }
 0x118   :  { %v204_v26 = vpop.f32.mrf.mxu1 }
 0x119   :  { %v205_v27 = vadd.f32 %v408_v25, %v204_v26 }
 0x11b   :  { %v208_v28 = vmax.f32 %v205_v27, 0.0 }
 0x11d   :  { %v209_v29 = vpack.c.bf16 %v208_v28, %v208_v28 }
 0x11f   :  { %286 = vmatmul.bf16.vlgmr.msra.gmra.mxu2 %v209_v29 }
 0x120   :  { %v206_v30 = vpop.f32.mrf.mxu1 }
 0x1a2   :  { %v287_v32 = vpop.f32.mrf.mxu2 }
 0x1a3   :  { %v288_v33 = vadd.f32 %v409_v31, %v287_v32 }
 0x1a5   :  { %410 = vtanh.f32 %v288_v33 }
 0x1aa   :  { %v289_v35 = vpop.f32.mrf.mxu2 }
 0x1ab   :  { %v411_v36 = vpop.eup %410 }
 0x1ac   :  { %v293_v37 = vmul.f32 %v411_v36, %v292_v34 }
 0x1ae   :  { %294 = vst [vmem:[#allocation11] sm:$0xff] %v293_v37 }
 0x1af   :  { %305 = dma.vmem_to_hbm [thread:$0]  %s301_s9, 128, %s303_s11, [#allocation5]  }
 0x1b0   :  { %538 = dma.done.wait [#allocation5], 128  }
 0x1b1   :  { %539 = vsyncadd [#allocation5], 4294967168 }
 0x1b2   :  { %310 = vsyncpa [#allocation4], 1 }
 0x1b3   :  { %311 = vsyncpa [#allocation7], 1 }
 0x1b4   :  { %312 = vsyncpa [#allocation10], 1 }
 0x1b5   :  { %313 = vsyncpa [#allocation5], 1 }

</bundles_post_ra>
